<compile_context>
chip_gen: v7x
topology: tpu7x:2x2x1
jax: 0.10.0
libtpu: 0.0.40
codegen_flags: <defaults>
</compile_context>

<pallas_src>
import functools

import jax
import jax.numpy as jnp
from jax.experimental import pallas as pl
from jax.experimental.pallas import tpu as pltpu


_MIB = 1024 * 1024


def _round_up(v, m):
    return ((v + m - 1) // m) * m


def _vmem_budget_bytes():
    """Per-generation scoped-VMEM budget (also passed as vmem_limit_bytes)."""
    try:
        cap = int(pltpu.get_tpu_info().vmem_capacity_bytes)
    except Exception:
        cap = 64 * _MIB                      # conservative (v7x-sized) default
    if cap >= 128 * _MIB:                    # v5e / v6e: 128 MiB physical VMEM
        return 96 * _MIB
    return min(48 * _MIB, (cap * 3) // 4)    # v7x: 64 MiB physical VMEM


def _choose_tile_hw(n, c, hw_pad, itemsize, budget):
    """Widest lane tile (multiple of 128 dividing hw_pad) whose double-buffered
    input+output tiles fit the budget, preferring >=2 (ideally even) grid steps
    (pipelining + v7x megacore). Returns None if even 128 lanes won't fit, in
    which case the C-tiled fallback path is used instead of failing compile."""
    # Double-buffered input (N, C, t) + output (N, C+1, t); sublane dim pads to 8.
    per_lane = 2 * itemsize * n * (_round_up(c, 8) + _round_up(c + 1, 8))
    usable = budget - 2 * _MIB               # small margin for internal scratch
    max_lanes = usable // per_lane
    if max_lanes < 128:
        return None
    k = hw_pad // 128
    fits = [d for d in range(1, k + 1) if k % d == 0 and 128 * d <= max_lanes]

    def score(d):
        steps = k // d
        return (steps >= 2, steps >= 2 and steps % 2 == 0, d)

    return 128 * max(fits, key=score)


def _choose_c_tiles(n, c, hw_pad, itemsize, budget):
    """(tile_hw, tile_c) for the C-tiled fallback: keep the lane tile wide
    (up to 1024 lanes, >=2 HW steps when possible) and shrink the channel
    block (sublane-aligned divisor of C) until the tiles fit."""
    usable = max(budget - 2 * _MIB, 1)
    k = hw_pad // 128
    hw_cands = [d for d in range(1, k + 1) if k % d == 0 and 128 * d <= 1024]
    hw_cands.sort(key=lambda d: (k // d >= 2, d), reverse=True)
    c_cands = [c] + sorted((d for d in range(8, c, 8) if c % d == 0), reverse=True)
    for dhw in hw_cands:
        t_hw = 128 * dhw
        for tc in c_cands:
            per_lane = (2 * itemsize * n * (2 * _round_up(tc, 8) + 8)  # in + out_x + out_vals
                        + 4 * 8)                                       # f32 running-sum scratch
            if per_lane * t_hw <= usable:
                return t_hw, tc
    return 128, c_cands[-1]


def _mbstd_kernel(x_ref, o_ref):
    """Fused path: full channel extent resident; tiled over the fused H*W axis."""
    n, c, t = x_ref.shape
    x = x_ref[...]                            # single VMEM load, reused below
    xf = x.astype(jnp.float32)

    # Biased (torch.mean) std over the batch axis, per (channel, pixel).
    mu = jnp.mean(xf, axis=0, keepdims=True)                              # (1, C, T)
    std = jnp.sqrt(jnp.mean((xf - mu) ** 2, axis=0, keepdims=True) + 1e-8)

    # averaging == 'all': mean over channels -> one value per pixel.
    vals = jnp.mean(std, axis=1, keepdims=True)                           # (1, 1, T)
    vals_b = jnp.broadcast_to(vals, (n, 1, t)).astype(o_ref.dtype)
    xo = x.astype(o_ref.dtype)

    if c % 8 == 0:
        # Sublane-aligned: one consolidated store (single vst stream).
        o_ref[...] = jnp.concatenate([xo, vals_b], axis=1)
    else:
        o_ref[:, :c, :] = xo
        o_ref[:, c:, :] = vals_b


def _mbstd_ctiled_kernel(x_ref, ox_ref, ov_ref, sum_ref, *, c_total):
    """Fallback for huge N*C: channel axis tiled on an inner 'arbitrary' grid
    axis; running sum of per-channel std kept in a VMEM scratch and the
    channel-mean map written on the last channel step."""
    j = pl.program_id(1)
    x = x_ref[...]
    xf = x.astype(jnp.float32)

    mu = jnp.mean(xf, axis=0, keepdims=True)
    std = jnp.sqrt(jnp.mean((xf - mu) ** 2, axis=0, keepdims=True) + 1e-8)  # (1, tc, T)
    partial = jnp.sum(std, axis=1, keepdims=True)                           # (1, 1, T)

    @pl.when(j == 0)
    def _():
        sum_ref[...] = jnp.zeros_like(sum_ref)

    sum_ref[...] += partial
    ox_ref[...] = x.astype(ox_ref.dtype)      # pass-through slab, every step

    @pl.when(j == pl.num_programs(1) - 1)
    def _():
        vals = sum_ref[...] * (1.0 / c_total)                               # (1, 1, T)
        ov_ref[...] = jnp.broadcast_to(vals, ov_ref.shape).astype(ov_ref.dtype)


def _mbstd_fused(x2, tile_hw, budget):
    N, C, HWp = x2.shape
    itemsize = jnp.dtype(x2.dtype).itemsize
    cost = pl.CostEstimate(
        flops=6 * N * C * HWp,
        transcendentals=C * HWp,
        bytes_accessed=itemsize * (N * C * HWp + N * (C + 1) * HWp),
    )
    return pl.pallas_call(
        _mbstd_kernel,
        out_shape=jax.ShapeDtypeStruct((N, C + 1, HWp), x2.dtype),
        grid=(HWp // tile_hw,),
        in_specs=[pl.BlockSpec((N, C, tile_hw), lambda i: (0, 0, i))],
        out_specs=pl.BlockSpec((N, C + 1, tile_hw), lambda i: (0, 0, i)),
        compiler_params=pltpu.CompilerParams(
            dimension_semantics=("parallel",),
            vmem_limit_bytes=budget,
        ),
        cost_estimate=cost,
    )(x2)


def _mbstd_c_tiled(x2, tile_hw, tile_c, budget):
    N, C, HWp = x2.shape
    itemsize = jnp.dtype(x2.dtype).itemsize
    cost = pl.CostEstimate(
        flops=6 * N * C * HWp,
        transcendentals=C * HWp,
        bytes_accessed=itemsize * (2 * N * C * HWp + N * HWp),
    )
    out_x, out_v = pl.pallas_call(
        functools.partial(_mbstd_ctiled_kernel, c_total=C),
        out_shape=(
            jax.ShapeDtypeStruct((N, C, HWp), x2.dtype),
            jax.ShapeDtypeStruct((N, 1, HWp), x2.dtype),
        ),
        grid=(HWp // tile_hw, C // tile_c),
        in_specs=[pl.BlockSpec((N, tile_c, tile_hw), lambda i, j: (0, j, i))],
        out_specs=(
            pl.BlockSpec((N, tile_c, tile_hw), lambda i, j: (0, j, i)),
            pl.BlockSpec((N, 1, tile_hw), lambda i, j: (0, 0, i)),
        ),
        scratch_shapes=[pltpu.VMEM((1, 1, tile_hw), jnp.float32)],
        compiler_params=pltpu.CompilerParams(
            dimension_semantics=("parallel", "arbitrary"),
            vmem_limit_bytes=budget,
        ),
        cost_estimate=cost,
    )(x2)
    # TODO(synk): this fallback pays one extra HBM pass for the concat; it is only
    # taken when N*C is too large for the fused single-output path to fit VMEM.
    return jnp.concatenate([out_x, out_v], axis=1)


def minibatch_stddev(x, *, _force_c_tiled=False, _tile_c=None, _tile_hw=None):
    """MinibatchStddev(averaging='all'): x (N, C, H, W) -> (N, C+1, H, W)."""
    N, C, H, W = x.shape
    HW = H * W
    x2 = x.reshape(N, C, HW)
    itemsize = jnp.dtype(x.dtype).itemsize

    # Pad the fused spatial axis to a lane multiple (padded pixels are sliced off
    # afterwards; per-pixel statistics reduce only over batch/channels, so real
    # pixels are unaffected).
    HWp = _round_up(HW, 128)
    if HWp != HW:
        x2 = jnp.pad(x2, ((0, 0), (0, 0), (0, HWp - HW)))

    budget = _vmem_budget_bytes()
    tile_hw = None if _force_c_tiled else _choose_tile_hw(N, C, HWp, itemsize, budget)

    if tile_hw is not None:
        out = _mbstd_fused(x2, tile_hw, budget)
    else:
        auto_hw, auto_c = _choose_c_tiles(N, C, HWp, itemsize, budget)
        out = _mbstd_c_tiled(x2, _tile_hw or auto_hw, _tile_c or auto_c, budget)

    if HWp != HW:
        out = out[:, :, :HW]
    return out.reshape(N, C + 1, H, W)


def _reference(x):
    mu = jnp.mean(x, axis=0, keepdims=True)
    std = jnp.sqrt(jnp.mean((x - mu) ** 2, axis=0, keepdims=True) + 1e-8)
    vals = jnp.mean(std, axis=1, keepdims=True)
    vals = jnp.broadcast_to(vals, (x.shape[0], 1) + x.shape[2:])
    return jnp.concatenate([x, vals], axis=1)


if __name__ == "__main__":
    key = jax.random.PRNGKey(0)
    k1, k2, k3, k4 = jax.random.split(key, 4)

    # 1) Fused path, 2 HW tiles, C not sublane-aligned (two-region store).
    x1 = jax.random.normal(k1, (2, 4, 16, 16), dtype=jnp.float32)
    o1 = jax.block_until_ready(minibatch_stddev(x1))
    assert o1.shape == (2, 5, 16, 16), o1.shape
    assert jnp.allclose(o1, _reference(x1), atol=1e-5), "mismatch (fused, C=4)"

    # 2) Fused path with sublane-aligned C (single consolidated store).
    x2 = jax.random.normal(k2, (2, 8, 16, 16), dtype=jnp.float32)
    o2 = jax.block_until_ready(minibatch_stddev(x2))
    assert jnp.allclose(o2, _reference(x2), atol=1e-5), "mismatch (fused, C=8)"

    # 3) Non-128-multiple spatial extent: HW padded to 128 and sliced after.
    x3 = jax.random.normal(k3, (2, 3, 10, 10), dtype=jnp.float32)
    o3 = jax.block_until_ready(minibatch_stddev(x3))
    assert o3.shape == (2, 4, 10, 10), o3.shape
    assert jnp.allclose(o3, _reference(x3), atol=1e-5), "mismatch (padded HW)"

    # 4) Forced C-tiled fallback: 2 HW tiles x 2 channel blocks (accumulator path).
    x4 = jax.random.normal(k4, (2, 16, 16, 16), dtype=jnp.float32)
    o4 = jax.block_until_ready(minibatch_stddev(x4, _force_c_tiled=True, _tile_c=8))
    assert jnp.allclose(o4, _reference(x4), atol=1e-5), "mismatch (C-tiled)"

    print("KERNEL_OK")
</pallas_src>

<mosaic_0001>
module attributes {stable_mosaic.version = 11 : i64} {
  func.func @_mbstd_kernel(%arg0: i32, %arg1: memref<2x4x128xf32, #tpu.memory_space<vmem>>, %arg2: memref<2x5x128xf32, #tpu.memory_space<vmem>>) attributes {dimension_semantics = [#tpu.dimension_semantics<parallel>], iteration_bounds = array<i64: 2>, scalar_prefetch = 0 : i64, scratch_operands = 0 : i64, tpu.core_type = #tpu.core_type<tc>, window_params = [{transform_indices = @transform_0, window_bounds = array<i64: 2, 4, 128>}, {transform_indices = @transform_1, window_bounds = array<i64: 2, 5, 128>}]} {
    %c0 = arith.constant 0 : index
    %c0_0 = arith.constant 0 : index
    %c0_1 = arith.constant 0 : index
    %0 = vector.load %arg1[%c0, %c0_0, %c0_1] : memref<2x4x128xf32, #tpu.memory_space<vmem>>, vector<2x4x128xf32>
    %cst = arith.constant dense<0.000000e+00> : vector<4x128xf32>
    %1 = vector.multi_reduction <add>, %0, %cst [0] : vector<2x4x128xf32> to vector<4x128xf32>
    %2 = vector.shape_cast %1 : vector<4x128xf32> to vector<1x4x128xf32>
    %cst_2 = arith.constant 2.000000e+00 : f32
    %3 = vector.broadcast %cst_2 : f32 to vector<1x4x128xf32>
    %4 = arith.divf %2, %3 : vector<1x4x128xf32>
    %5 = vector.broadcast %4 : vector<1x4x128xf32> to vector<2x4x128xf32>
    %6 = arith.subf %0, %5 : vector<2x4x128xf32>
    %7 = arith.mulf %6, %6 : vector<2x4x128xf32>
    %cst_3 = arith.constant dense<0.000000e+00> : vector<4x128xf32>
    %8 = vector.multi_reduction <add>, %7, %cst_3 [0] : vector<2x4x128xf32> to vector<4x128xf32>
    %9 = vector.shape_cast %8 : vector<4x128xf32> to vector<1x4x128xf32>
    %cst_4 = arith.constant 2.000000e+00 : f32
    %10 = vector.broadcast %cst_4 : f32 to vector<1x4x128xf32>
    %11 = arith.divf %9, %10 : vector<1x4x128xf32>
    %cst_5 = arith.constant 9.99999993E-9 : f32
    %12 = vector.broadcast %cst_5 : f32 to vector<1x4x128xf32>
    %13 = arith.addf %11, %12 : vector<1x4x128xf32>
    %14 = math.sqrt %13 : vector<1x4x128xf32>
    %cst_6 = arith.constant dense<0.000000e+00> : vector<1x128xf32>
    %15 = vector.multi_reduction <add>, %14, %cst_6 [1] : vector<1x4x128xf32> to vector<1x128xf32>
    %16 = vector.shape_cast %15 : vector<1x128xf32> to vector<1x1x128xf32>
    %cst_7 = arith.constant 4.000000e+00 : f32
    %17 = vector.broadcast %cst_7 : f32 to vector<1x1x128xf32>
    %18 = arith.divf %16, %17 : vector<1x1x128xf32>
    %19 = vector.shape_cast %18 : vector<1x1x128xf32> to vector<1x1x128xf32>
    %20 = vector.broadcast %19 : vector<1x1x128xf32> to vector<2x1x128xf32>
    %c0_8 = arith.constant 0 : index
    %c0_9 = arith.constant 0 : index
    %c0_10 = arith.constant 0 : index
    %21 = vector.load %arg2[%c0_8, %c0_9, %c0_10] : memref<2x5x128xf32, #tpu.memory_space<vmem>>, vector<2x4x128xf32>
    tpu.vector_store %arg2[%c0_8, %c0_9, %c0_10], %0 {strides = array<i32>} : memref<2x5x128xf32, #tpu.memory_space<vmem>>, vector<2x4x128xf32>,
    %c0_11 = arith.constant 0 : index
    %c4 = arith.constant 4 : index
    %c0_12 = arith.constant 0 : index
    %22 = vector.load %arg2[%c0_11, %c4, %c0_12] : memref<2x5x128xf32, #tpu.memory_space<vmem>>, vector<2x1x128xf32>
    tpu.vector_store %arg2[%c0_11, %c4, %c0_12], %20 {strides = array<i32>} : memref<2x5x128xf32, #tpu.memory_space<vmem>>, vector<2x1x128xf32>,
    return
  }
  func.func @transform_0(%arg0: i32) -> (i32, i32, i32) {
    %c0_i32 = arith.constant 0 : i32
    %c0_i32_0 = arith.constant 0 : i32
    %c0_i32_1 = arith.constant 0 : i32
    return %c0_i32, %c0_i32_0, %arg0 : i32, i32, i32
  }
  func.func @transform_1(%arg0: i32) -> (i32, i32, i32) {
    %c0_i32 = arith.constant 0 : i32
    %c0_i32_0 = arith.constant 0 : i32
    %c0_i32_1 = arith.constant 0 : i32
    return %c0_i32, %c0_i32_0, %arg0 : i32, i32, i32
  }
}

</mosaic_0001>

<bundles_post_ra>
// kernel: tpu_custom_call.1
= control target key start
LH: loop header
LB: loop body
LE: loop exit
PB: predicated region body
PF: predicated region fallthrough
CT: control target
= control target key end

     0   :  { %6 = vsyncpa [#allocation3], 0  ;;  %s541_s0 = inlined_call_operand.hbm [shape: f32[2,4,256], index: 0, kind: input, shape index: {}]   ;;  %s542_s1 = inlined_call_operand.vmem [shape: f32[2,5,256], index: 1, kind: output, shape index: {}]  }
   0x1   :  { %8 = vsyncpa [#allocation3 + $0x1], 0  ;;  %s410_s6 = smov 0   ;;  %s412_s7 = smov 0  }
   0x2   :  { %s414_s8 = smov 0   ;;  %s416_s9 = smov 0  }
   0x3 LB: > { %s429_s10 = sadd.s32 4294967295, %s394_s9   ;;  %s432_s11 = sadd.s32 1, %s394_s9   ;;  %s394_s9 = sphi %s416_s9, %s551_s9   ;;  %s390_s8 = sphi %s414_s8, %s550_s8   ;;  %s386_s7 = sphi %s412_s7, %s549_s7   ;;  %s382_s6 = sphi %s410_s6, %s548_s6  }
   0x4   : > { %s18_s12 = ssub.s32 %s394_s9, %s432_s11  ;;  %s21_s13 = sadd.s32 1, %s390_s8 }
   0x5   : > { %p19_p0 = scmp.eq.s32.totalorder %s18_s12, 0  ;;  %p28_p1 = scmp.ne.s32.totalorder %s390_s8, %s386_s7 }
   0x6   : > { %p29_p2 = scmp.eq.s32.totalorder %s394_s9, 0  ;;  %p34_p3 = scmp.ne.s32.totalorder %s386_s7, %s382_s6 }
   0x7   : > { %s442_s14 = scalar_select %p19_p0, %s390_s8, %s21_s13  }
   0x8   : > { %p444_p4 = por %p29_p2, %p28_p1  ;;  %p35_p5 = scmp.eq.s32.totalorder %s429_s10, 0 }
   0x9   : > { %p58_p6 = scmp.eq.s32.totalorder %s429_s10, 1  ;;  %p292_p8 = scmp.lt.s32.totalorder %s394_s9, 2 }
   0xa   : > { %p450_p7 = por %p35_p5, %p34_p3  ;;  %s84_s18 = sand.u32 1, %s390_s8  }
   0xb   : > { %p455_p9 = por %p58_p6, %p28_p1  ;;  %s277_s19 = sshll.u32 %s84_s18, 3 }
   0xc   : > { %s278_s20 = sshll.u32 %s394_s9, 6  ;;  %s88_s24 = scalar_lea.vmem [#allocation2], %s277_s19 }
   0xd   : > { %s545_s17 = scalar_select %p455_p9, 1, 0 }
   0xe   : > { %s464_s23 = scalar_lea.hbm %s541_s0, %s278_s20  ;;  %s94_s25 = sshll.u32 %s88_s24, 4  ;;  %s466_s25 = int_to_ptr.vmem [resolvable:$true] %s94_s25 }
   0xf   : > { %p470_p10 = pnand %p292_p8, %p444_p4  ;;  %s474_s27 = scalar_lea.sflag [#allocation3], %s84_s18 }
  0x10   : > { %s330_s28 = scalar_lea.hbm %s464_s23, 128  ;;  %s335_s2 = scalar_lea.hbm %s541_s0, 256 }
  0x11   : > { %p331_p11 = scmp.ne.s32.totalorder %s464_s23, %s330_s28  ;;  %p332_p12 = pneg %p470_p10 }
  0x12   : > { %p336_p1 = scmp.lt.u32.totalorder %s464_s23, %s541_s0  ;;  %p337_p2 = scmp.lt.u32.totalorder %s335_s2, %s330_s28 }
  0x13   : > { %p333_p13 = pnand %p332_p12, %p331_p11  ;;  %p339_p4 = scmp.lt.u32.totalorder %s330_s28, %s464_s23 }
  0x14   : > { %p338_p3 = por %p337_p2, %p336_p1 }
  0x15   : > { %p334_p0 = pneg %p333_p13 }
  0x16   : > { %p340_p5 = por %p339_p4, %p338_p3 }
  0x18   : > { %p341_p6 = pnand %p340_p5, %p334_p0 }
  0x1a   : > { %344 = shalt.err (!%p341_p6)
}
  0x1b   : > { %s345_s5 = scalar_lea.vmem %s466_s25, 128  ;;  %s396_s6 = smov [#allocation2]  }
  0x1c   : > { %p346_p8 = scmp.ne.s32.totalorder %s466_s25, %s345_s5  ;;  %s350_s12 = sshll.u32 %s396_s6, 4  ;;  %s351_s12 = int_to_ptr.vmem [resolvable:$false] %s350_s12 }
  0x1d   : > { %s352_s13 = scalar_lea.vmem %s351_s12, 256  ;;  %p353_p9 = scmp.lt.s32.totalorder %s466_s25, %s351_s12 }
  0x1e   : > { %p348_p11 = pnand %p346_p8, %p332_p12  ;;  %p354_p1 = scmp.lt.s32.totalorder %s352_s13, %s345_s5 }
  0x20   : > { %p349_p13 = pneg %p348_p11  ;;  %p355_p2 = por %p354_p1, %p353_p9 }
  0x22   : > { %p356_p3 = pnand %p355_p2, %p349_p13 }
  0x24   : > { %359 = shalt.err (!%p356_p3)
}
  0x25   : > { %s397_s15 = smov 128   ;;  %s398_s18 = smov 64  }
  0x26   : > { %s399_s19 = smov 4   ;;  %p279_p12 = scmp.ge.s32.totalorder %s394_s9, 1 }
  0x27   : > { %291 = dma.hbm_to_vmem [thread:$0]  (!%p470_p10), %s464_s23, 128, %s466_s25, %s474_s27, %s397_s15, %s398_s18, %s399_s19  }
  0x28   : > { %p102_p0 = scmp.lt.s32.totalorder %s394_s9, 3 }
  0x2a   : > { %p103_p4 = pnand %p279_p12, %p102_p0 }
  0x2b   : > { %s108_s20 = sand.u32 (!%p103_p4), 1, %s386_s7  }
  0x2c   : > { %106 = sbr.rel (%p103_p4) target bundleno = 109 (0x6d), region = 24  ;;  %s280_s21 = sshll.u32 (!%p103_p4), %s108_s20, 3 }
  0x2d   : > { %s109_s22 = scalar_lea.sflag (!%p103_p4), [#allocation3], %s108_s20  ;;  %s112_s24 = scalar_lea.vmem (!%p103_p4), [#allocation2], %s280_s21 }
  0x33   : > { %377 = dma.done.wait (%p450_p7), %s109_s22, 128  }
  0x34   : > { %379 = vsyncadd (%p450_p7), %s109_s22, 4294967168  ;;  %s281_s28 = sshll.u32 %s108_s20, 4  ;;  %vm132_vm0 = vcmask 1043456   ;;  %v130_v0 = vld [vmem:[%s112_s24] sm:$0xf]  ;;  %p547_p7 = scmp.ne.s32.totalorder %s545_s17, 0 }
  0x35   : > { %v131_v1 = vld [vmem:[%s112_s24 + $0x4] sm:$0xf]  ;;  %v133_v2 = vsel %vm132_vm0, %v130_v0, 0.0  ;;  %s510_s9 = scalar_lea.vmem [#allocation4], %s281_s28  ;;  %s283_s16 = sshll.u32 (%p547_p7), %s429_s10, 3 }
  0x36   : > { %163 = vst [vmem:[%s510_s9] sm:$0xf] %v130_v0  ;;  %v134_v3 = vsel %vm132_vm0, %v131_v1, 0.0  ;;  %164 = vst [vmem:[%s510_s9 + $0x8] sm:$0xf] %v131_v1  ;;  %s175_s26 = scalar_lea.vmem (%p547_p7), %s542_s1, %s283_s16 }
  0x37   : > { %v135_v4 = vadd.f32 %v134_v3, %v133_v2 }
  0x39   : > { %v137_v5 = vmul.f32 0.5, %v135_v4 }
  0x3b   : > { %v138_v6 = vsub.f32 %v130_v0, %v137_v5  ;;  %v139_v7 = vsub.f32 %v131_v1, %v137_v5 }
  0x3d   : > { %v140_v8 = vmul.f32 %v138_v6, %v138_v6  ;;  %v141_v9 = vmul.f32 %v139_v7, %v139_v7 }
  0x3f   : > { %v142_v10 = vsel %vm132_vm0, %v140_v8, 0.0  ;;  %v143_v11 = vsel %vm132_vm0, %v141_v9, 0.0 }
  0x40   : > { %v144_v12 = vadd.f32 %v143_v11, %v142_v10 }
  0x42   : > { %v145_v13 = vmul.f32 0.5, %v144_v12 }
  0x44   : > { %v146_v14 = vadd.f32 1e-08, %v145_v13 }
  0x46   : > { %328 = vrsqrt.f32 %v146_v14  ;;  %vm149_vm1 = vcmp.eq.f32.partialorder %v146_v14, inf  ;;  %v152_v16 = vand.u32 2147483648, %v146_v14  ;;  %vm151_vm2 = vcmp.eq.f32.partialorder %v146_v14, 0.0 }
  0x50   : > { %v329_v15 = vpop.eup %328 }
  0x51   : > { %v148_v17 = vmul.f32 %v329_v15, %v146_v14 }
  0x53   : > { %v150_v18 = vsel %vm149_vm1, %v146_v14, %v148_v17 }
  0x54   : > { %v153_v19 = vsel %vm151_vm2, %v152_v16, %v150_v18 }
  0x55   : > { %v154_v20 = vsel %vm132_vm0, %v153_v19, 0.0 }
  0x56   : > { %v155_v21 = vrot.slane %v154_v20, 4 }
  0x58   : > { %v156_v22 = vadd.f32 %v155_v21, %v154_v20 }
  0x5a   : > { %v157_v23 = vrot.slane %v156_v22, 2 }
  0x5c   : > { %v158_v24 = vadd.f32 %v157_v23, %v156_v22 }
  0x5e   : > { %v159_v25 = vrot.slane %v158_v24, 1  ;;  %173 = sbr.rel (!%p547_p7) target bundleno = 109 (0x6d), region = 32 }
  0x60   : > { %v160_v26 = vadd.f32 %v159_v25, %v158_v24 }
  0x62   : > { %v162_v27 = vmul.f32 0.25, %v160_v26 }
  0x64   : > { %165 = vst [vmem:[%s510_s9 + $0x4] sm:$0x1] %v162_v27  ;;  %166 = vst [vmem:[%s510_s9 + $0xc] sm:$0x1] %v162_v27 }
  0x6b   : > { %v205_v28 = vld [vmem:[%s510_s9] sm:$0xff]  ;;  %v207_v29 = vld [vmem:[%s510_s9 + $0x8] sm:$0xff] }
  0x6c   : > { %206 = vst [vmem:[%s175_s26] sm:$0xff] %v205_v28  ;;  %208 = vst [vmem:[%s175_s26 + $0x10] sm:$0xff] %v207_v29 }
  0x6d PF: > { %p11_p9 = scmp.ge.s32.totalorder %s432_s11, 4   ;;  %s548_s6 = smov %s386_s7 }
  0x6e   : > { %s549_s7 = smov %s390_s8  ;;  %s550_s8 = smov %s442_s14 }
  0x6f   : > { %s551_s9 = smov %s432_s11  ;;  %13 = sbr.rel (!%p11_p9) target bundleno = 3 (0x3), region = 102 }
  0x76   :  { %224 = vsyncpa [#allocation3], 1 }
  0x77   :  { %226 = vsyncpa [#allocation3 + $0x1], 1 }

</bundles_post_ra>
